<compile_context>
chip_gen: v6e
topology: v6e:2x2x1
jax: 0.10.0
libtpu: 0.0.40
codegen_flags: <defaults>
</compile_context>

<pallas_src>
import jax
import jax.numpy as jnp
from jax import lax
from jax.experimental import pallas as pl
from jax.experimental.pallas import tpu as pltpu


def _round_up(x, m):
    return ((x + m - 1) // m) * m


def _linear_kernel(xt_ref, w_ref, o_ref):
    # xt_ref: (F, TM) lane-dense tile of x^T; w_ref: (F, H) weight, resident across steps.
    # Contract the shared leading F axis on the MXU (same structure as a matmul weight-grad),
    # accumulate in f32, cast once to the output dtype.
    o_ref[...] = lax.dot_general(
        xt_ref[...],
        w_ref[...],
        dimension_numbers=(((0,), (0,)), ((), ())),
        preferred_element_type=jnp.float32,
    ).astype(o_ref.dtype)


def time_feature_embedding(x, weight, *, tm=512, out_dtype=None):
    """Pallas equivalent of nn.Linear(input_size, hidden_size, bias=False) on (B, L, F).

    x:      (B, L, input_size)
    weight: (hidden_size, input_size)   -- PyTorch Linear convention
    returns (B, L, hidden_size) in `out_dtype` (default: x.dtype; pass jnp.bfloat16 to halve
    the dominant output HBM traffic when the consumer accepts bf16).
    """
    B, L, F = x.shape
    H, F2 = weight.shape
    assert F == F2, "weight last dim must equal input_size"
    if out_dtype is None:
        out_dtype = x.dtype

    M = B * L

    # Row-tile choice:
    #  - small problems: one full-extent tile (always layout-legal, zero padding).
    #  - large problems: an even number of ~tm-sized tiles, rounded to 128 so the x^T tile's
    #    lane dim is dense and the output tile's sublane dim is aligned for every dtype.
    if M <= tm:
        TM = M
        grid_m = 1
    else:
        n_tiles = 2 * pl.cdiv(M, 2 * tm)          # even tile count -> balances v7x's 2 TCs
        TM = _round_up(pl.cdiv(M, n_tiles), 128)  # lane-dense x^T tiles, sublane-aligned out
        grid_m = pl.cdiv(M, TM)

    # Wrapper-side layout plumbing only touches tiny arrays (M*F and F*H elements).
    xt = x.reshape(M, F).T        # (F, M): per-step tiles (F, TM) are lane-dense
    wT = weight.T                 # (F, H): resident in VMEM across all grid steps

    cost = pl.CostEstimate(
        flops=2 * M * F * H,
        transcendentals=0,
        bytes_accessed=(
            M * F * jnp.dtype(x.dtype).itemsize
            + F * H * jnp.dtype(weight.dtype).itemsize
            + M * H * jnp.dtype(out_dtype).itemsize
        ),
    )

    out = pl.pallas_call(
        _linear_kernel,
        out_shape=jax.ShapeDtypeStruct((M, H), out_dtype),
        grid_spec=pl.GridSpec(
            grid=(grid_m,),
            in_specs=[
                pl.BlockSpec((F, TM), lambda i: (0, i)),  # x^T row-tile, pipelined (ragged tail OK)
                pl.BlockSpec((F, H), lambda i: (0, 0)),   # weight: constant index -> stays resident
            ],
            out_specs=pl.BlockSpec((TM, H), lambda i: (i, 0)),
        ),
        compiler_params=pltpu.CompilerParams(
            # Megacore sharding on v7x; no-op on single-TC v5e/v6e. Double-buffered
            # (TM, H) tiles stay well under the 16/32/32 MiB default scoped-VMEM limits.
            dimension_semantics=("parallel",),
        ),
        cost_estimate=cost,
    )(xt, wT)

    return out.reshape(B, L, H)


if __name__ == "__main__":
    # Shapes implied by the module: x (batch, seq, input_size) -> (batch, seq, hidden_size)
    batch, seq, input_size, hidden_size = 2, 8, 4, 32

    key = jax.random.PRNGKey(0)
    kx, kw = jax.random.split(key)
    x = jax.random.normal(kx, (batch, seq, input_size), dtype=jnp.float32)
    # PyTorch Linear weight shape: (hidden_size, input_size)
    weight = jax.random.normal(kw, (hidden_size, input_size), dtype=jnp.float32) * 0.1

    # Small single-tile case, f32 out (exact semantics of nn.Linear bias=False).
    y = time_feature_embedding(x, weight)
    jax.block_until_ready(y)
    y_ref = jnp.einsum("blf,hf->blh", x, weight)
    assert y.shape == (batch, seq, hidden_size)
    assert jnp.allclose(y, y_ref, atol=1e-5, rtol=1e-5)

    # Multi-tile / ragged-last-tile case with a bf16 output (exercises the grid path and
    # the decoupled out_dtype). Still tiny shapes.
    b2, s2, f2, h2 = 4, 200, 4, 96   # M = 800 > tm=512 -> grid of 2, ragged last tile
    kx2, kw2 = jax.random.split(jax.random.PRNGKey(1))
    x2 = jax.random.normal(kx2, (b2, s2, f2), dtype=jnp.float32)
    w2 = jax.random.normal(kw2, (h2, f2), dtype=jnp.float32) * 0.1
    y2 = time_feature_embedding(x2, w2, out_dtype=jnp.bfloat16)
    jax.block_until_ready(y2)
    y2_ref = jnp.einsum("blf,hf->blh", x2, w2)
    assert y2.shape == (b2, s2, h2)
    assert jnp.allclose(y2.astype(jnp.float32), y2_ref, atol=2e-2, rtol=2e-2)

    print("KERNEL_OK")
</pallas_src>

<mosaic_0001>
module attributes {stable_mosaic.version = 11 : i64} {
  func.func @_linear_kernel(%arg0: i32, %arg1: memref<4x16xf32, #tpu.memory_space<vmem>>, %arg2: memref<4x32xf32, #tpu.memory_space<vmem>>, %arg3: memref<16x32xf32, #tpu.memory_space<vmem>>) attributes {dimension_semantics = [#tpu.dimension_semantics<parallel>], iteration_bounds = array<i64: 1>, scalar_prefetch = 0 : i64, scratch_operands = 0 : i64, tpu.core_type = #tpu.core_type<tc>, window_params = [{transform_indices = @transform_0, window_bounds = array<i64: 4, 16>}, {pipeline_mode = #tpu.pipeline_mode<synchronous>, transform_indices = @transform_1, window_bounds = array<i64: 4, 32>}, {transform_indices = @transform_2, window_bounds = array<i64: 16, 32>}]} {
    %c0 = arith.constant 0 : index
    %c0_0 = arith.constant 0 : index
    %0 = vector.load %arg1[%c0, %c0_0] : memref<4x16xf32, #tpu.memory_space<vmem>>, vector<4x16xf32>
    %c0_1 = arith.constant 0 : index
    %c0_2 = arith.constant 0 : index
    %1 = vector.load %arg2[%c0_1, %c0_2] : memref<4x32xf32, #tpu.memory_space<vmem>>, vector<4x32xf32>
    %cst = arith.constant dense<0.000000e+00> : vector<16x32xf32>
    %2 = tpu.matmul %0, %1, %cst {dimension_numbers = #tpu.dot_dimension_numbers<[0], [0], [1], [1], [0, 1, 1, 1], [], []>} : vector<4x16xf32>, vector<4x32xf32>, vector<16x32xf32> -> vector<16x32xf32>
    %c0_3 = arith.constant 0 : index
    %c0_4 = arith.constant 0 : index
    %3 = vector.load %arg3[%c0_3, %c0_4] : memref<16x32xf32, #tpu.memory_space<vmem>>, vector<16x32xf32>
    tpu.vector_store %arg3[%c0_3, %c0_4], %2 {strides = array<i32>} : memref<16x32xf32, #tpu.memory_space<vmem>>, vector<16x32xf32>,
    return
  }
  func.func @transform_0(%arg0: i32) -> (i32, i32) {
    %c0_i32 = arith.constant 0 : i32
    %c0_i32_0 = arith.constant 0 : i32
    return %c0_i32, %arg0 : i32, i32
  }
  func.func @transform_1(%arg0: i32) -> (i32, i32) {
    %c0_i32 = arith.constant 0 : i32
    %c0_i32_0 = arith.constant 0 : i32
    %c0_i32_1 = arith.constant 0 : i32
    return %c0_i32, %c0_i32_0 : i32, i32
  }
  func.func @transform_2(%arg0: i32) -> (i32, i32) {
    %c0_i32 = arith.constant 0 : i32
    %c0_i32_0 = arith.constant 0 : i32
    return %arg0, %c0_i32 : i32, i32
  }
}

</mosaic_0001>

<bundles_post_ra>
// kernel: tpu_custom_call.1
= control target key start
LH: loop header
LB: loop body
LE: loop exit
PB: predicated region body
PF: predicated region fallthrough
CT: control target
= control target key end

     0   :  { %7 = vsyncpa [#allocation3], 0  ;;  %s289_s0 = inlined_call_operand.hbm [shape: f32[4,16], index: 0, kind: input, shape index: {}]   ;;  %s290_s1 = inlined_call_operand.hbm [shape: f32[4,32], index: 1, kind: input, shape index: {}]   ;;  %s291_s2 = inlined_call_operand.hbm [shape: f32[16,32], index: 2, kind: output, shape index: {}]  }
   0x1   :  { %8 = vsyncpa [#allocation6], 0 }
   0x2   :  { %9 = vsyncpa [#allocation4], 0  ;;  %s260_s9 = smov [#allocation2]   ;;  %s261_s11 = smov [#allocation5]  }
   0x3   :  { %s16_s10 = sshll.u32 %s260_s9, 4  ;;  %s26_s12 = sshll.u32 %s261_s11, 4  ;;  %s17_s10 = int_to_ptr.vmem [resolvable:$true] %s16_s10  ;;  %s27_s12 = int_to_ptr.vmem [resolvable:$true] %s26_s12 }
   0x4   :  { %s202_s13 = scalar_lea.vmem %s17_s10, 64  ;;  %p207_p1 = scmp.lt.s32.totalorder %s17_s10, %s17_s10 }
   0x5   :  { %p203_p0 = scmp.ne.s32.totalorder %s17_s10, %s202_s13  ;;  %p208_p2 = scmp.lt.s32.totalorder %s202_s13, %s202_s13 }
   0x7   :  { %p209_p3 = por %p208_p2, %p207_p1 }
   0x9   :  { %p210_p4 = pnand %p209_p3, %p203_p0 }
   0xb   :  { %213 = shalt.err (!%p210_p4)
}
   0xc   :  { %19 = dma.hbm_to_vmem [thread:$0]  %s289_s0, 64, %s17_s10, [#allocation3]  }
   0xd   :  { %s222_s16 = scalar_lea.vmem %s27_s12, 64  ;;  %p227_p6 = scmp.lt.s32.totalorder %s27_s12, %s27_s12 }
   0xe   :  { %p223_p5 = scmp.ne.s32.totalorder %s27_s12, %s222_s16  ;;  %p228_p7 = scmp.lt.s32.totalorder %s222_s16, %s222_s16 }
  0x10   :  { %p229_p8 = por %p228_p7, %p227_p6 }
  0x12   :  { %p230_p9 = pnand %p229_p8, %p223_p5 }
  0x14   :  { %233 = shalt.err (!%p230_p9)
}
  0x15   :  { %29 = dma.hbm_to_vmem [thread:$0]  %s290_s1, 64, %s27_s12, [#allocation6]  }
  0x16   :  { %254 = dma.done.wait [#allocation3], 64  }
  0x17   :  { %255 = vsyncadd [#allocation3], 4294967232 }
  0x18   :  { %256 = dma.done.wait [#allocation6], 64  }
  0x19   :  { %257 = vsyncadd [#allocation6], 4294967232  ;;  %vm77_vm0 = vcmask 1043456   ;;  %v36_v0 = vld [vmem:[#allocation2] sm:$0xf]  ;;  %vm70_vm1 = vcmask 31744  }
  0x1a   :  { %v37_v1 = vld [vmem:[#allocation5] sm:$0xf]  ;;  %38 = vxpose.xlu0.b32.start.end [1/1] (short) (narrow) %v36_v0, 16  ;;  %s262_s0 = smov [#allocation7]   ;;  %vm156_vm2 = vcmask 261120  }
  0x1b   :  { %183 = vmatprep.subr.msk.mxu0 %vm77_vm0, %v37_v1  ;;  %s164_s19 = sshll.u32 %s262_s0, 4  ;;  %s165_s19 = int_to_ptr.vmem [resolvable:$true] %s164_s19 }
  0x1c   :  { %184 = vmatpush3.msk.msra.mxu0 %vm77_vm0, %v37_v1  ;;  %s234_s1 = scalar_lea.vmem %s165_s19, 256  ;;  %p239_p11 = scmp.lt.s32.totalorder %s165_s19, %s165_s19 }
  0x1d   :  { %p235_p10 = scmp.ne.s32.totalorder %s165_s19, %s234_s1  ;;  %p240_p12 = scmp.lt.s32.totalorder %s234_s1, %s234_s1 }
  0x1f   :  { %p241_p13 = por %p240_p12, %p239_p11 }
  0x21   :  { %p242_p0 = pnand %p241_p13, %p235_p10 }
  0x96   :  { %v54_v2 = vpop.trf.xlu0 }
  0x97   :  { %185 = vmatprep.mubr.msk.f32.mxu0 %vm70_vm1, %v54_v2 }
  0x9a   :  { %v55_v3 = vpop.trf.xlu0 }
  0x9b   :  { %186 = vmatmul.mubr.msk.f32.vlgmr.msra.gmra.mxu0 %vm70_vm1, %v55_v3 }
 0x15b   :  { %v187_v4 = vpop.f32.mrf.mxu0 }
 0x15c   :  { %158 = vst.msk [vmem:[#allocation7 + $0x8] sm:$0xff] %vm156_vm2, %v187_v4 }
 0x15d   :  { %v147_v5 = vpop.f32.mrf.mxu0 }
 0x15e   :  { %157 = vst.msk [vmem:[#allocation7] sm:$0xff] %vm156_vm2, %v147_v5 }
 0x15f   :  { %245 = shalt.err (!%p242_p0)
}
 0x160   :  { %s263_s20 = smov 128   ;;  %s264_s21 = smov 8  }
 0x161   :  { %170 = dma.vmem_to_hbm [thread:$0]  %s165_s19, 256, %s291_s2, [#allocation4], %s263_s20, %s263_s20, %s264_s21  }
 0x162   :  { %258 = dma.done.wait [#allocation4], 256  }
 0x163   :  { %259 = vsyncadd [#allocation4], 4294967040 }
 0x164   :  { %174 = vsyncpa [#allocation3], 1 }
 0x165   :  { %175 = vsyncpa [#allocation6], 1 }
 0x166   :  { %176 = vsyncpa [#allocation4], 1 }

</bundles_post_ra>
